<compile_context>
chip_gen: v5e
topology: v5e:2x2
jax: 0.10.0
libtpu: 0.0.40
codegen_flags: <defaults>
</compile_context>

<pallas_src>
import math
import jax
import jax.numpy as jnp
from jax.experimental import pallas as pl
from jax.experimental.pallas import tpu as pltpu

INPUT_SIZE = 6
HIDDEN1 = 128
HIDDEN2 = 64
HIDDEN3 = 32
NUM_CLASSES = 2

IN_PAD = 8            # fc1 input dim padded 6 -> 8 (sublane multiple, MXU K)
OUT_PAD = 8           # fc4 output dim padded 2 -> 8 (sublane multiple for f32)
LANE = 128            # batch tile must be a multiple of the lane width
MAX_BATCH_TILE = 4096 # batch (lane) tile cap; ~6 MiB VMEM per step at this size


def _round_up(n, m):
    return ((n + m - 1) // m) * m


def mlp_kernel(xt_ref, w1_ref, b1_ref, w2_ref, b2_ref,
               w3_ref, b3_ref, w4_ref, b4_ref, o_ref):
    # Feature-major chain: features in sublanes, batch in lanes.
    # All matmuls hit the MXU with bf16 operands and f32 accumulation.
    xt = xt_ref[...].astype(jnp.bfloat16)                                # (8,  TB)

    h = jnp.dot(w1_ref[...], xt, preferred_element_type=jnp.float32)    # (128,TB)
    h = jnp.maximum(h + b1_ref[...], 0.0)

    h = jnp.dot(w2_ref[...], h.astype(jnp.bfloat16),
                preferred_element_type=jnp.float32)                     # (64, TB)
    h = jnp.maximum(h + b2_ref[...], 0.0)

    h = jnp.dot(w3_ref[...], h.astype(jnp.bfloat16),
                preferred_element_type=jnp.float32)                     # (32, TB)
    h = jnp.maximum(h + b3_ref[...], 0.0)

    out = jnp.dot(w4_ref[...], h.astype(jnp.bfloat16),
                  preferred_element_type=jnp.float32)                   # (8,  TB)
    o_ref[...] = out + b4_ref[...]


def prepare_params(params):
    """One-time, per-model prep (hoisted out of the per-call hot path):
    transpose to feature-major (out, in), pad fc1 in-dim 6->8 and fc4 out-dim
    2->8 with zeros, cast MXU weight operands to bf16. Biases stay f32 and are
    shaped (out, 1) for lane-broadcast against (out, TB) activations."""
    w1t = jnp.pad(params["w1"].T,
                  ((0, 0), (0, IN_PAD - INPUT_SIZE))).astype(jnp.bfloat16)   # (128, 8)
    b1t = params["b1"].reshape(HIDDEN1, 1).astype(jnp.float32)               # (128, 1)
    w2t = params["w2"].T.astype(jnp.bfloat16)                                # (64, 128)
    b2t = params["b2"].reshape(HIDDEN2, 1).astype(jnp.float32)               # (64, 1)
    w3t = params["w3"].T.astype(jnp.bfloat16)                                # (32, 64)
    b3t = params["b3"].reshape(HIDDEN3, 1).astype(jnp.float32)               # (32, 1)
    w4t = jnp.pad(params["w4"].T,
                  ((0, OUT_PAD - NUM_CLASSES), (0, 0))).astype(jnp.bfloat16) # (8, 32)
    b4t = jnp.pad(params["b4"].reshape(NUM_CLASSES, 1),
                  ((0, OUT_PAD - NUM_CLASSES), (0, 0))).astype(jnp.float32)  # (8, 1)
    return dict(w1t=w1t, b1t=b1t, w2t=w2t, b2t=b2t,
                w3t=w3t, b3t=b3t, w4t=w4t, b4t=b4t)


def _choose_batch_tile(batch, max_tile):
    """Pick a lane-aligned batch tile so that (a) padding waste stays well under
    one tile for unlucky batch sizes and (b) mid/large batches keep >= 2 tiles
    (v7x has 2 TensorCores; one giant tile would idle one of them)."""
    max_tile = max(LANE, _round_up(max_tile, LANE))
    b_al = _round_up(max(batch, 1), LANE)
    n_tiles = max(-(-b_al // max_tile), 2 if b_al >= 2 * LANE else 1)
    tb = _round_up(-(-b_al // n_tiles), LANE)
    n_tiles = -(-b_al // tb)
    return tb, n_tiles, n_tiles * tb


def _resident(arr):
    # Whole-array block, constant index_map -> DMA'd once, VMEM-resident
    # across all batch-tile grid steps.
    nd = arr.ndim
    return pl.BlockSpec(arr.shape, lambda *_: (0,) * nd)


def neural_net_forward(x, prepared, batch_tile=MAX_BATCH_TILE):
    """x: (B, INPUT_SIZE) float32. prepared: output of prepare_params()."""
    B = x.shape[0]
    tb, n_tiles, padded_b = _choose_batch_tile(B, batch_tile)

    # Feature-major input slab (8, padded_B) f32: rows 0..5 are the real
    # features, rows 6..7 zero (match w1t's zero-padded columns -> exact).
    # x stays f32; the bf16 cast for the MXU happens inside the kernel.
    x_t = jnp.pad(x.T, ((0, IN_PAD - INPUT_SIZE), (0, padded_b - B)))

    w1t, b1t = prepared["w1t"], prepared["b1t"]
    w2t, b2t = prepared["w2t"], prepared["b2t"]
    w3t, b3t = prepared["w3t"], prepared["b3t"]
    w4t, b4t = prepared["w4t"], prepared["b4t"]

    out_t = pl.pallas_call(
        mlp_kernel,
        out_shape=jax.ShapeDtypeStruct((OUT_PAD, padded_b), jnp.float32),
        grid=(n_tiles,),
        in_specs=[
            pl.BlockSpec((IN_PAD, tb), lambda i: (0, i)),
            _resident(w1t), _resident(b1t),
            _resident(w2t), _resident(b2t),
            _resident(w3t), _resident(b3t),
            _resident(w4t), _resident(b4t),
        ],
        out_specs=pl.BlockSpec((OUT_PAD, tb), lambda i: (0, i)),
        compiler_params=pltpu.CompilerParams(
            dimension_semantics=("parallel",),   # v7x: shard batch tiles over 2 TCs
            vmem_limit_bytes=32 * 1024 * 1024,   # explicit; safe on all generations
        ),
    )(x_t, w1t, b1t, w2t, b2t, w3t, b3t, w4t, b4t)

    # Padded batch columns / padded class rows are garbage / exact zeros; both
    # are dropped here.
    return out_t[:NUM_CLASSES, :B].T


def init_params(key):
    """Deterministic init matching PyTorch nn.Linear default
    (uniform(-1/sqrt(fan_in), 1/sqrt(fan_in))). Weights stored as (in, out),
    biases as (1, out) — the natural layout for the pure-JAX reference."""
    dims = [(INPUT_SIZE, HIDDEN1), (HIDDEN1, HIDDEN2),
            (HIDDEN2, HIDDEN3), (HIDDEN3, NUM_CLASSES)]
    params = {}
    for idx, (fan_in, fan_out) in enumerate(dims, start=1):
        key, kw, kb = jax.random.split(key, 3)
        bound = 1.0 / math.sqrt(fan_in)
        params[f"w{idx}"] = jax.random.uniform(
            kw, (fan_in, fan_out), jnp.float32, -bound, bound)
        params[f"b{idx}"] = jax.random.uniform(
            kb, (1, fan_out), jnp.float32, -bound, bound)
    return params


def reference_forward(x, params):
    h = jnp.maximum(x @ params["w1"] + params["b1"], 0.0)
    h = jnp.maximum(h @ params["w2"] + params["b2"], 0.0)
    h = jnp.maximum(h @ params["w3"] + params["b3"], 0.0)
    return h @ params["w4"] + params["b4"]


if __name__ == "__main__":
    key = jax.random.PRNGKey(0)
    key, kx = jax.random.split(key)
    batch = 8
    x = jax.random.normal(kx, (batch, INPUT_SIZE), jnp.float32)

    params = init_params(key)
    prepared = prepare_params(params)   # one-time weight transpose/pad/bf16 cast

    out = neural_net_forward(x, prepared)
    out = jax.block_until_ready(out)

    ref = reference_forward(x, params)
    assert out.shape == (batch, NUM_CLASSES)
    # bf16 MXU operands (f32 accumulation) vs the pure-f32 reference -> looser tol.
    assert jnp.allclose(out, ref, atol=5e-2, rtol=5e-2), \
        float(jnp.max(jnp.abs(out - ref)))

    print("KERNEL_OK")
</pallas_src>

<mosaic_0001>
module attributes {stable_mosaic.version = 11 : i64} {
  func.func @mlp_kernel(%arg0: i32, %arg1: memref<8x128xf32, #tpu.memory_space<vmem>>, %arg2: memref<128x8xbf16, #tpu.memory_space<vmem>>, %arg3: memref<128x1xf32, #tpu.memory_space<vmem>>, %arg4: memref<64x128xbf16, #tpu.memory_space<vmem>>, %arg5: memref<64x1xf32, #tpu.memory_space<vmem>>, %arg6: memref<32x64xbf16, #tpu.memory_space<vmem>>, %arg7: memref<32x1xf32, #tpu.memory_space<vmem>>, %arg8: memref<8x32xbf16, #tpu.memory_space<vmem>>, %arg9: memref<8x1xf32, #tpu.memory_space<vmem>>, %arg10: memref<8x128xf32, #tpu.memory_space<vmem>>) attributes {dimension_semantics = [#tpu.dimension_semantics<parallel>], iteration_bounds = array<i64: 1>, scalar_prefetch = 0 : i64, scratch_operands = 0 : i64, tpu.core_type = #tpu.core_type<tc>, window_params = [{transform_indices = @transform_0, window_bounds = array<i64: 8, 128>}, {pipeline_mode = #tpu.pipeline_mode<synchronous>, transform_indices = @transform_1, window_bounds = array<i64: 128, 8>}, {pipeline_mode = #tpu.pipeline_mode<synchronous>, transform_indices = @transform_2, window_bounds = array<i64: 128, 1>}, {pipeline_mode = #tpu.pipeline_mode<synchronous>, transform_indices = @transform_3, window_bounds = array<i64: 64, 128>}, {pipeline_mode = #tpu.pipeline_mode<synchronous>, transform_indices = @transform_4, window_bounds = array<i64: 64, 1>}, {pipeline_mode = #tpu.pipeline_mode<synchronous>, transform_indices = @transform_5, window_bounds = array<i64: 32, 64>}, {pipeline_mode = #tpu.pipeline_mode<synchronous>, transform_indices = @transform_6, window_bounds = array<i64: 32, 1>}, {pipeline_mode = #tpu.pipeline_mode<synchronous>, transform_indices = @transform_7, window_bounds = array<i64: 8, 32>}, {pipeline_mode = #tpu.pipeline_mode<synchronous>, transform_indices = @transform_8, window_bounds = array<i64: 8, 1>}, {transform_indices = @transform_9, window_bounds = array<i64: 8, 128>}]} {
    %c0 = arith.constant 0 : index
    %c0_0 = arith.constant 0 : index
    %0 = vector.load %arg1[%c0, %c0_0] : memref<8x128xf32, #tpu.memory_space<vmem>>, vector<8x128xf32>
    %1 = arith.truncf %0 : vector<8x128xf32> to vector<8x128xbf16>
    %c0_1 = arith.constant 0 : index
    %c0_2 = arith.constant 0 : index
    %2 = vector.load %arg2[%c0_1, %c0_2] : memref<128x8xbf16, #tpu.memory_space<vmem>>, vector<128x8xbf16>
    %cst = arith.constant dense<0.000000e+00> : vector<128x128xf32>
    %3 = tpu.matmul %2, %1, %cst {dimension_numbers = #tpu.dot_dimension_numbers<[1], [0], [0], [1], [0, 0, 1, 1], [], []>} : vector<128x8xbf16>, vector<8x128xbf16>, vector<128x128xf32> -> vector<128x128xf32>
    %c0_3 = arith.constant 0 : index
    %c0_4 = arith.constant 0 : index
    %4 = vector.load %arg3[%c0_3, %c0_4] : memref<128x1xf32, #tpu.memory_space<vmem>>, vector<128x1xf32>
    %5 = vector.broadcast %4 : vector<128x1xf32> to vector<128x128xf32>
    %6 = arith.addf %3, %5 : vector<128x128xf32>
    %cst_5 = arith.constant 0.000000e+00 : f32
    %7 = vector.broadcast %cst_5 : f32 to vector<128x128xf32>
    %8 = arith.maximumf %6, %7 : vector<128x128xf32>
    %c0_6 = arith.constant 0 : index
    %c0_7 = arith.constant 0 : index
    %9 = vector.load %arg4[%c0_6, %c0_7] : memref<64x128xbf16, #tpu.memory_space<vmem>>, vector<64x128xbf16>
    %10 = arith.truncf %8 : vector<128x128xf32> to vector<128x128xbf16>
    %cst_8 = arith.constant dense<0.000000e+00> : vector<64x128xf32>
    %11 = tpu.matmul %9, %10, %cst_8 {dimension_numbers = #tpu.dot_dimension_numbers<[1], [0], [0], [1], [0, 0, 1, 1], [], []>} : vector<64x128xbf16>, vector<128x128xbf16>, vector<64x128xf32> -> vector<64x128xf32>
    %c0_9 = arith.constant 0 : index
    %c0_10 = arith.constant 0 : index
    %12 = vector.load %arg5[%c0_9, %c0_10] : memref<64x1xf32, #tpu.memory_space<vmem>>, vector<64x1xf32>
    %13 = vector.broadcast %12 : vector<64x1xf32> to vector<64x128xf32>
    %14 = arith.addf %11, %13 : vector<64x128xf32>
    %cst_11 = arith.constant 0.000000e+00 : f32
    %15 = vector.broadcast %cst_11 : f32 to vector<64x128xf32>
    %16 = arith.maximumf %14, %15 : vector<64x128xf32>
    %c0_12 = arith.constant 0 : index
    %c0_13 = arith.constant 0 : index
    %17 = vector.load %arg6[%c0_12, %c0_13] : memref<32x64xbf16, #tpu.memory_space<vmem>>, vector<32x64xbf16>
    %18 = arith.truncf %16 : vector<64x128xf32> to vector<64x128xbf16>
    %cst_14 = arith.constant dense<0.000000e+00> : vector<32x128xf32>
    %19 = tpu.matmul %17, %18, %cst_14 {dimension_numbers = #tpu.dot_dimension_numbers<[1], [0], [0], [1], [0, 0, 1, 1], [], []>} : vector<32x64xbf16>, vector<64x128xbf16>, vector<32x128xf32> -> vector<32x128xf32>
    %c0_15 = arith.constant 0 : index
    %c0_16 = arith.constant 0 : index
    %20 = vector.load %arg7[%c0_15, %c0_16] : memref<32x1xf32, #tpu.memory_space<vmem>>, vector<32x1xf32>
    %21 = vector.broadcast %20 : vector<32x1xf32> to vector<32x128xf32>
    %22 = arith.addf %19, %21 : vector<32x128xf32>
    %cst_17 = arith.constant 0.000000e+00 : f32
    %23 = vector.broadcast %cst_17 : f32 to vector<32x128xf32>
    %24 = arith.maximumf %22, %23 : vector<32x128xf32>
    %c0_18 = arith.constant 0 : index
    %c0_19 = arith.constant 0 : index
    %25 = vector.load %arg8[%c0_18, %c0_19] : memref<8x32xbf16, #tpu.memory_space<vmem>>, vector<8x32xbf16>
    %26 = arith.truncf %24 : vector<32x128xf32> to vector<32x128xbf16>
    %cst_20 = arith.constant dense<0.000000e+00> : vector<8x128xf32>
    %27 = tpu.matmul %25, %26, %cst_20 {dimension_numbers = #tpu.dot_dimension_numbers<[1], [0], [0], [1], [0, 0, 1, 1], [], []>} : vector<8x32xbf16>, vector<32x128xbf16>, vector<8x128xf32> -> vector<8x128xf32>
    %c0_21 = arith.constant 0 : index
    %c0_22 = arith.constant 0 : index
    %28 = vector.load %arg9[%c0_21, %c0_22] : memref<8x1xf32, #tpu.memory_space<vmem>>, vector<8x1xf32>
    %29 = vector.broadcast %28 : vector<8x1xf32> to vector<8x128xf32>
    %30 = arith.addf %27, %29 : vector<8x128xf32>
    %c0_23 = arith.constant 0 : index
    %c0_24 = arith.constant 0 : index
    %31 = vector.load %arg10[%c0_23, %c0_24] : memref<8x128xf32, #tpu.memory_space<vmem>>, vector<8x128xf32>
    tpu.vector_store %arg10[%c0_23, %c0_24], %30 {strides = array<i32>} : memref<8x128xf32, #tpu.memory_space<vmem>>, vector<8x128xf32>,
    return
  }
  func.func @transform_0(%arg0: i32) -> (i32, i32) {
    %c0_i32 = arith.constant 0 : i32
    %c0_i32_0 = arith.constant 0 : i32
    return %c0_i32, %arg0 : i32, i32
  }
  func.func @transform_1(%arg0: i32) -> (i32, i32) {
    %c0_i32 = arith.constant 0 : i32
    %c0_i32_0 = arith.constant 0 : i32
    %c0_i32_1 = arith.constant 0 : i32
    return %c0_i32, %c0_i32_0 : i32, i32
  }
  func.func @transform_2(%arg0: i32) -> (i32, i32) {
    %c0_i32 = arith.constant 0 : i32
    %c0_i32_0 = arith.constant 0 : i32
    %c0_i32_1 = arith.constant 0 : i32
    return %c0_i32, %c0_i32_0 : i32, i32
  }
  func.func @transform_3(%arg0: i32) -> (i32, i32) {
    %c0_i32 = arith.constant 0 : i32
    %c0_i32_0 = arith.constant 0 : i32
    %c0_i32_1 = arith.constant 0 : i32
    return %c0_i32, %c0_i32_0 : i32, i32
  }
  func.func @transform_4(%arg0: i32) -> (i32, i32) {
    %c0_i32 = arith.constant 0 : i32
    %c0_i32_0 = arith.constant 0 : i32
    %c0_i32_1 = arith.constant 0 : i32
    return %c0_i32, %c0_i32_0 : i32, i32
  }
  func.func @transform_5(%arg0: i32) -> (i32, i32) {
    %c0_i32 = arith.constant 0 : i32
    %c0_i32_0 = arith.constant 0 : i32
    %c0_i32_1 = arith.constant 0 : i32
    return %c0_i32, %c0_i32_0 : i32, i32
  }
  func.func @transform_6(%arg0: i32) -> (i32, i32) {
    %c0_i32 = arith.constant 0 : i32
    %c0_i32_0 = arith.constant 0 : i32
    %c0_i32_1 = arith.constant 0 : i32
    return %c0_i32, %c0_i32_0 : i32, i32
  }
  func.func @transform_7(%arg0: i32) -> (i32, i32) {
    %c0_i32 = arith.constant 0 : i32
    %c0_i32_0 = arith.constant 0 : i32
    %c0_i32_1 = arith.constant 0 : i32
    return %c0_i32, %c0_i32_0 : i32, i32
  }
  func.func @transform_8(%arg0: i32) -> (i32, i32) {
    %c0_i32 = arith.constant 0 : i32
    %c0_i32_0 = arith.constant 0 : i32
    %c0_i32_1 = arith.constant 0 : i32
    return %c0_i32, %c0_i32_0 : i32, i32
  }
  func.func @transform_9(%arg0: i32) -> (i32, i32) {
    %c0_i32 = arith.constant 0 : i32
    %c0_i32_0 = arith.constant 0 : i32
    return %c0_i32, %arg0 : i32, i32
  }
}

</mosaic_0001>

<bundles_post_ra>
// kernel: tpu_custom_call.1
= control target key start
LH: loop header
LB: loop body
LE: loop exit
PB: predicated region body
PF: predicated region fallthrough
CT: control target
= control target key end

     0   :  { %vm213_vm0 = vcmask 1043456   ;;  %v643_v3 = vmov 0   ;;  %vm188_vm1 = vcmask 64512   ;;  %s845_s0 = inlined_call_operand.vmem [shape: f32[8,128], index: 0, kind: input, shape index: {}]   ;;  %s846_s1 = inlined_call_operand.vmem [shape: bf16[128,8], index: 1, kind: input, shape index: {}]   ;;  %s847_s2 = inlined_call_operand.vmem [shape: f32[128,1], index: 2, kind: input, shape index: {}]   ;;  %s848_s3 = inlined_call_operand.vmem [shape: bf16[64,128], index: 3, kind: input, shape index: {}]   ;;  %s849_s4 = inlined_call_operand.vmem [shape: f32[64,1], index: 4, kind: input, shape index: {}]   ;;  %s850_s5 = inlined_call_operand.vmem [shape: bf16[32,64], index: 5, kind: input, shape index: {}]   ;;  %s851_s6 = inlined_call_operand.vmem [shape: f32[32,1], index: 6, kind: input, shape index: {}]   ;;  %s852_s7 = inlined_call_operand.vmem [shape: bf16[8,32], index: 7, kind: input, shape index: {}]   ;;  %s853_s8 = inlined_call_operand.vmem [shape: f32[8,1], index: 8, kind: input, shape index: {}]   ;;  %s854_s9 = inlined_call_operand.hbm [shape: f32[8,128], index: 9, kind: output, shape index: {}]  }
   0x1   :  { %v66_v0 = vld [vmem:[%s847_s2 + $0x70] sm:$0xff]  ;;  %v64_v1 = vld [vmem:[%s847_s2 + $0x60] sm:$0xff]  ;;  %615 = vset.pattern.permute.xlu1 %v643_v3  ;;  %614 = vset.pattern.permute.xlu0 %v643_v3  ;;  %v594_v8 = vld [vmem:[%s846_s1 + $0x28] sm:$0xff] }
   0x2   :  { %v34_v2 = vld [vmem:[%s845_s0] sm:$0xff]  ;;  %140 = vperm.xlu0 %614, %v66_v0   ;;  %130 = vperm.xlu1 %615, %v64_v1   ;;  %v62_v5 = vld [vmem:[%s847_s2 + $0x50] sm:$0xff]  ;;  %v67_v9 = vld [vmem:[%s847_s2 + $0x78] sm:$0xff] }
   0x3   :  { %v35_v4 = vpack.c.bf16 %v34_v2, %v34_v2  ;;  %v589_v7 = vld [vmem:[%s846_s1] sm:$0xff]  ;;  %616 = vset.pattern.permute.xlu2 %v643_v3  ;;  %v65_v10 = vld [vmem:[%s847_s2 + $0x68] sm:$0xff] }
   0x4   :  { %120 = vperm.xlu2 %616, %v62_v5  }
   0x5   :  { %v215_v6 = vsel %vm213_vm0, %v35_v4, 0 }
   0x6   :  { %224 = vmatpush.bf16.msra.mxu0 %v215_v6  ;;  %603 = vmatpush.bf16.msra.mxu3 %v215_v6 }
   0x9   :  { %554 = vmatmul.msk.bf16.vlgmr.msra.gmra.mxu0 %vm188_vm1, %v589_v7  ;;  %559 = vmatmul.msk.bf16.vlgmr.msra.gmra.mxu3 %vm188_vm1, %v594_v8 }
   0xa   :  { %14 = vsyncpa [#allocation3], 0  ;;  %145 = vperm.xlu0 %614, %v67_v9   ;;  %135 = vperm.xlu1 %615, %v65_v10   ;;  %v63_v11 = vld [vmem:[%s847_s2 + $0x58] sm:$0xff]  ;;  %v61_v12 = vld [vmem:[%s847_s2 + $0x48] sm:$0xff]  ;;  %vm449_vm2 = vcmask 523264   ;;  %vm488_vm3 = vcmask 261120  }
   0xb   :  { %v60_v13 = vld [vmem:[%s847_s2 + $0x40] sm:$0xff]  ;;  %v58_v14 = vld [vmem:[%s847_s2 + $0x30] sm:$0xff]  ;;  %v590_v15 = vld [vmem:[%s846_s1 + $0x8] sm:$0xff]  ;;  %s644_s24 = smov [#allocation2]   ;;  %s513_s28 = sshll.u32 %s854_s9, 4  ;;  %s514_s28 = int_to_ptr.hbm [resolvable:$true] %s513_s28 }
   0xc   :  { %125 = vperm.xlu2 %616, %v63_v11   ;;  %v595_v16 = vld [vmem:[%s846_s1 + $0x30] sm:$0xff]  ;;  %v59_v17 = vld [vmem:[%s847_s2 + $0x38] sm:$0xff]  ;;  %v56_v18 = vld [vmem:[%s847_s2 + $0x20] sm:$0xff]  ;;  %s511_s25 = sshll.u32 %s644_s24, 4  ;;  %s512_s25 = int_to_ptr.vmem [resolvable:$true] %s511_s25 }
   0xd   :  { %v57_v19 = vld [vmem:[%s847_s2 + $0x28] sm:$0xff]  ;;  %v55_v20 = vld [vmem:[%s847_s2 + $0x18] sm:$0xff]  ;;  %v54_v21 = vld [vmem:[%s847_s2 + $0x10] sm:$0xff] }
   0xe   :  { %v52_v22 = vld [vmem:[%s847_s2] sm:$0xff]  ;;  %v591_v23 = vld [vmem:[%s846_s1 + $0x10] sm:$0xff]  ;;  %v596_v24 = vld [vmem:[%s846_s1 + $0x38] sm:$0xff] }
   0xf   :  { %v304_v25 = vld [vmem:[%s849_s4 + $0x30] sm:$0xff]  ;;  %v53_v26 = vld [vmem:[%s847_s2 + $0x8] sm:$0xff]  ;;  %v305_v27 = vld [vmem:[%s849_s4 + $0x38] sm:$0xff] }
  0x10   :  { %v303_v28 = vld [vmem:[%s849_s4 + $0x28] sm:$0xff]  ;;  %v302_v29 = vld [vmem:[%s849_s4 + $0x20] sm:$0xff]  ;;  %v300_v30 = vld [vmem:[%s849_s4 + $0x10] sm:$0xff] }
  0x11   :  { %v592_v31 = vld [vmem:[%s846_s1 + $0x18] sm:$0xff]  ;;  %v298_v32 = vld [vmem:[%s849_s4] sm:$0xff]  ;;  %v299_v34 = vld [vmem:[%s849_s4 + $0x8] sm:$0xff] }
  0x12   :  { %115 = vperm.xlu1 %615, %v61_v12   ;;  %110 = vperm.xlu0 %614, %v60_v13   ;;  %v301_v33 = vld [vmem:[%s849_s4 + $0x18] sm:$0xff]  ;;  %v417_v36 = vld [vmem:[%s851_s6 + $0x10] sm:$0xff]  ;;  %v415_v37 = vld [vmem:[%s851_s6] sm:$0xff] }
  0x13   :  { %v418_v35 = vld [vmem:[%s851_s6 + $0x18] sm:$0xff]  ;;  %v593_v38 = vld [vmem:[%s846_s1 + $0x20] sm:$0xff]  ;;  %v416_v40 = vld [vmem:[%s851_s6 + $0x8] sm:$0xff] }
  0x14   :  { %100 = vperm.xlu2 %616, %v58_v14   ;;  %v482_v39 = vld [vmem:[%s853_s8] sm:$0xff] }
  0x19   :  { %555 = vmatmul.msk.bf16.gmra.mxu0 %vm188_vm1, %v590_v15  ;;  %560 = vmatmul.msk.bf16.gmra.mxu3 %vm188_vm1, %v595_v16 }
  0x1a   :  { %105 = vperm.xlu0 %614, %v59_v17   ;;  %90 = vperm.xlu1 %615, %v56_v18  }
  0x1c   :  { %95 = vperm.xlu2 %616, %v57_v19  }
  0x22   :  { %85 = vperm.xlu1 %615, %v55_v20   ;;  %80 = vperm.xlu0 %614, %v54_v21  }
  0x24   :  { %70 = vperm.xlu2 %616, %v52_v22  }
  0x29   :  { %556 = vmatmul.msk.bf16.gmra.mxu0 %vm188_vm1, %v591_v23  ;;  %561 = vmatmul.msk.bf16.gmra.mxu3 %vm188_vm1, %v596_v24 }
  0x2a   :  { %338 = vperm.xlu1 %615, %v304_v25   ;;  %75 = vperm.xlu0 %614, %v53_v26  }
  0x2c   :  { %343 = vperm.xlu2 %616, %v305_v27  }
  0x32   :  { %333 = vperm.xlu1 %615, %v303_v28   ;;  %328 = vperm.xlu0 %614, %v302_v29  }
  0x34   :  { %318 = vperm.xlu2 %616, %v300_v30  }
  0x39   :  { %557 = vmatmul.msk.bf16.gmra.mxu0 %vm188_vm1, %v592_v31 }
  0x3a   :  { %308 = vperm.xlu1 %615, %v298_v32   ;;  %323 = vperm.xlu0 %614, %v301_v33  }
  0x3c   :  { %313 = vperm.xlu2 %616, %v299_v34  }
  0x42   :  { %436 = vperm.xlu1 %615, %v418_v35   ;;  %431 = vperm.xlu0 %614, %v417_v36  }
  0x44   :  { %421 = vperm.xlu2 %616, %v415_v37  }
  0x49   :  { %558 = vmatmul.msk.bf16.gmra.mxu0 %vm188_vm1, %v593_v38 }
  0x4a   :  { %485 = vperm.xlu1 %615, %v482_v39   ;;  %426 = vperm.xlu0 %614, %v416_v40  }
  0x5e   :  { %v121_v41 = vpop.permute.xlu2 %120 }
  0x66   :  { %v126_v43 = vpop.permute.xlu2 %125 }
  0x6e   :  { %v101_v45 = vpop.permute.xlu2 %100 }
  0x74   :  { %v141_v42 = vpop.permute.xlu0 %140  ;;  %v131_v2 = vpop.permute.xlu1 %130 }
  0x76   :  { %v96_v51 = vpop.permute.xlu2 %95 }
  0x7c   :  { %v146_v44 = vpop.permute.xlu0 %145  ;;  %v136_v6 = vpop.permute.xlu1 %135 }
  0x7e   :  { %v71_v55 = vpop.permute.xlu2 %70 }
  0x84   :  { %v111_v46 = vpop.permute.xlu0 %110  ;;  %v116_v24 = vpop.permute.xlu1 %115 }
  0x86   :  { %v226_v47 = vpop.f32.mrf.mxu0 }
  0x87   :  { %v227_v57 = vadd.f32 %v226_v47, %v71_v55 }
  0x89   :  { %v266_v61 = vmax.f32 %v227_v57, 0.0 }
  0x8c   :  { %v251_v48 = vpop.f32.mrf.mxu3  ;;  %v106_v49 = vpop.permute.xlu0 %105 }
  0x8d   :  { %v252_v14 = vadd.f32 %v251_v48, %v121_v41  ;;  %v91_v26 = vpop.permute.xlu1 %90 }
  0x8e   :  { %v228_v50 = vpop.f32.mrf.mxu0 }
  0x8f   :  { %v276_v19 = vmax.f32 %v252_v14, 0.0 }
  0x94   :  { %v253_v52 = vpop.f32.mrf.mxu3  ;;  %v81_v53 = vpop.permute.xlu0 %80 }
  0x95   :  { %v254_v15 = vadd.f32 %v253_v52, %v126_v43  ;;  %v86_v39 = vpop.permute.xlu1 %85  ;;  %v599_v52 = vld [vmem:[%s848_s3 + $0x10] sm:$0xff] }
  0x96   :  { %v231_v54 = vpop.f32.mrf.mxu0 }
  0x97   :  { %v277_v20 = vmax.f32 %v254_v15, 0.0  ;;  %v232_v43 = vadd.f32 %v231_v54, %v81_v53 }
  0x99   :  { %v295_v23 = vpack.c.bf16 %v277_v20, %v276_v19 }
  0x9c   :  { %v256_v56 = vpop.f32.mrf.mxu3  ;;  %v76_v58 = vpop.permute.xlu0 %75 }
  0x9d   :  { %v229_v59 = vadd.f32 %v228_v50, %v76_v58  ;;  %v257_v8 = vadd.f32 %v256_v56, %v131_v2  ;;  %v600_v50 = vld [vmem:[%s848_s3 + $0x18] sm:$0xff]  ;;  %v339_v56 = vpop.permute.xlu1 %338  ;;  %v344_v58 = vpop.permute.xlu2 %343 }
  0x9e   :  { %v233_v60 = vpop.f32.mrf.mxu0 }
  0x9f   :  { %v267_v62 = vmax.f32 %v229_v59, 0.0  ;;  %v278_v16 = vmax.f32 %v257_v8, 0.0  ;;  %v234_v40 = vadd.f32 %v233_v60, %v86_v39 }
  0xa1   :  { %v817_v63 = vpack.c.bf16 %v267_v62, %v266_v61 }
  0xa4   :  { %v258_v0 = vpop.f32.mrf.mxu3  ;;  %v329_v2 = vpop.permute.xlu0 %328 }
  0xa5   :  { %v259_v9 = vadd.f32 %v258_v0, %v136_v6 }
  0xa6   :  { %v236_v1 = vpop.f32.mrf.mxu0 }
  0xa7   :  { %v279_v17 = vmax.f32 %v259_v9, 0.0  ;;  %v237_v37 = vadd.f32 %v236_v1, %v91_v26  ;;  %v602_v26 = vld [vmem:[%s850_s5 + $0x8] sm:$0xff] }
  0xa9   :  { %v296_v21 = vpack.c.bf16 %v279_v17, %v278_v16 }
  0xac   :  { %v261_v3 = vpop.f32.mrf.mxu3 }
  0xad   :  { %v262_v5 = vadd.f32 %v261_v3, %v141_v42 }
  0xae   :  { %v238_v4 = vpop.f32.mrf.mxu0 }
  0xaf   :  { %v280_v10 = vmax.f32 %v262_v5, 0.0  ;;  %v239_v34 = vadd.f32 %v238_v4, %v96_v51  ;;  %v598_v51 = vld [vmem:[%s848_s3 + $0x8] sm:$0xff]  ;;  %v319_v4 = vpop.permute.xlu2 %318  ;;  %v334_v5 = vpop.permute.xlu1 %333 }
  0xb1   :  { %v271_v41 = vmax.f32 %v239_v34, 0.0 }
  0xb4   :  { %v263_v7 = vpop.f32.mrf.mxu3 }
  0xb5   :  { %v264_v11 = vadd.f32 %v263_v7, %v146_v44  ;;  %v270_v44 = vmax.f32 %v237_v37, 0.0  ;;  %v324_v7 = vpop.permute.xlu0 %323 }
  0xb6   :  { %v241_v13 = vpop.f32.mrf.mxu0 }
  0xb7   :  { %v281_v12 = vmax.f32 %v264_v11, 0.0  ;;  %v242_v31 = vadd.f32 %v241_v13, %v101_v45  ;;  %v292_v47 = vpack.c.bf16 %v271_v41, %v270_v44  ;;  %v268_v45 = vmax.f32 %v232_v43, 0.0  ;;  %v314_v14 = vpop.permute.xlu2 %313 }
  0xb9   :  { %v297_v18 = vpack.c.bf16 %v281_v12, %v280_v10  ;;  %v272_v38 = vmax.f32 %v242_v31, 0.0 }
  0xbb   :  { %370 = vmatpush.bf16.msra.mxu1 %v297_v18  ;;  %604 = vmatpush.bf16.msra.mxu2 %v297_v18  ;;  %v309_v18 = vpop.permute.xlu1 %308 }
  0xbe   :  { %v243_v22 = vpop.f32.mrf.mxu0 }
  0xbf   :  { %371 = vmatpush.bf16.msra.mxu1 %v296_v21  ;;  %605 = vmatpush.bf16.msra.mxu2 %v296_v21  ;;  %v244_v29 = vadd.f32 %v243_v22, %v106_v49  ;;  %v597_v49 = vld [vmem:[%s848_s3] sm:$0xff]  ;;  %v422_v37 = vpop.permute.xlu2 %421 }
  0xc1   :  { %v273_v35 = vmax.f32 %v244_v29, 0.0  ;;  %v432_v29 = vpop.permute.xlu0 %431 }
  0xc3   :  { %372 = vmatpush.bf16.msra.mxu1 %v295_v23  ;;  %606 = vmatpush.bf16.msra.mxu2 %v295_v23  ;;  %v293_v42 = vpack.c.bf16 %v273_v35, %v272_v38  ;;  %v437_v31 = vpop.permute.xlu1 %436 }
  0xc6   :  { %v246_v25 = vpop.f32.mrf.mxu0 }
  0xc7   :  { %v247_v27 = vadd.f32 %v246_v25, %v111_v46  ;;  %v269_v46 = vmax.f32 %v234_v40, 0.0  ;;  %v601_v25 = vld [vmem:[%s850_s5] sm:$0xff] }
  0xc9   :  { %v274_v32 = vmax.f32 %v247_v27, 0.0  ;;  %v291_v48 = vpack.c.bf16 %v269_v46, %v268_v45  ;;  %v479_v46 = vld [vmem:[%s852_s7] sm:$0xf] }
  0xce   :  { %v248_v28 = vpop.f32.mrf.mxu0 }
  0xcf   :  { %v249_v30 = vadd.f32 %v248_v28, %v116_v24 }
  0xd1   :  { %v275_v33 = vmax.f32 %v249_v30, 0.0 }
  0xd3   :  { %v294_v36 = vpack.c.bf16 %v275_v33, %v274_v32  ;;  %v427_v33 = vpop.permute.xlu0 %426 }
  0xd5   :  { %373 = vmatpush.bf16.msra.mxu1 %v294_v36  ;;  %607 = vmatpush.bf16.msra.mxu2 %v294_v36 }
  0xd9   :  { %374 = vmatpush.bf16.msra.mxu1 %v293_v42  ;;  %608 = vmatpush.bf16.msra.mxu2 %v293_v42 }
  0xdd   :  { %375 = vmatpush.bf16.msra.mxu1 %v292_v47  ;;  %609 = vmatpush.bf16.msra.mxu2 %v292_v47  ;;  %v486_v47 = vpop.permute.xlu1 %485 }
  0xe1   :  { %376 = vmatpush.bf16.msra.mxu1 %v291_v48  ;;  %610 = vmatpush.bf16.msra.mxu2 %v291_v48 }
  0xe5   :  { %377 = vmatpush.bf16.msra.mxu1 %v817_v63  ;;  %611 = vmatpush.bf16.msra.mxu2 %v817_v63 }
  0xe8   :  { %378 = vmatmul.bf16.vlgmr.msra.gmra.mxu1 %v597_v49  ;;  %393 = vmatmul.bf16.vlgmr.msra.gmra.mxu2 %v600_v50 }
  0xf8   :  { %383 = vmatmul.bf16.gmra.mxu1 %v598_v51 }
 0x108   :  { %388 = vmatmul.bf16.gmra.mxu1 %v599_v52 }
 0x165   :  { %v379_v53 = vpop.f32.mrf.mxu1 }
 0x166   :  { %v380_v19 = vadd.f32 %v379_v53, %v309_v18 }
 0x168   :  { %v399_v23 = vmax.f32 %v380_v19, 0.0 }
 0x16b   :  { %v394_v54 = vpop.f32.mrf.mxu2 }
 0x16c   :  { %v395_v57 = vadd.f32 %v394_v54, %v339_v56 }
 0x16d   :  { %v381_v55 = vpop.f32.mrf.mxu1 }
 0x16e   :  { %v405_v62 = vmax.f32 %v395_v57, 0.0  ;;  %v382_v15 = vadd.f32 %v381_v55, %v314_v14 }
 0x170   :  { %v400_v21 = vmax.f32 %v382_v15, 0.0 }
 0x172   :  { %v411_v24 = vpack.c.bf16 %v400_v21, %v399_v23 }
 0x173   :  { %v396_v59 = vpop.f32.mrf.mxu2 }
 0x174   :  { %v397_v60 = vadd.f32 %v396_v59, %v344_v58 }
 0x175   :  { %v384_v61 = vpop.f32.mrf.mxu1 }
 0x176   :  { %v406_v63 = vmax.f32 %v397_v60, 0.0  ;;  %v385_v11 = vadd.f32 %v384_v61, %v319_v4 }
 0x178   :  { %v414_v0 = vpack.c.bf16 %v406_v63, %v405_v62  ;;  %v401_v20 = vmax.f32 %v385_v11, 0.0 }
 0x17a   :  { %460 = vmatpush.bf16.msrb.mxu2 %v414_v0 }
 0x17d   :  { %v386_v1 = vpop.f32.mrf.mxu1 }
 0x17e   :  { %v387_v9 = vadd.f32 %v386_v1, %v324_v7 }
 0x180   :  { %v402_v16 = vmax.f32 %v387_v9, 0.0 }
 0x182   :  { %v412_v22 = vpack.c.bf16 %v402_v16, %v401_v20 }
 0x185   :  { %v389_v3 = vpop.f32.mrf.mxu1 }
 0x186   :  { %v390_v6 = vadd.f32 %v389_v3, %v329_v2 }
 0x188   :  { %v403_v12 = vmax.f32 %v390_v6, 0.0 }
 0x18d   :  { %v391_v8 = vpop.f32.mrf.mxu1 }
 0x18e   :  { %v392_v10 = vadd.f32 %v391_v8, %v334_v5 }
 0x190   :  { %v404_v13 = vmax.f32 %v392_v10, 0.0 }
 0x192   :  { %v413_v17 = vpack.c.bf16 %v404_v13, %v403_v12 }
 0x194   :  { %461 = vmatpush.bf16.msrb.mxu2 %v413_v17 }
 0x198   :  { %462 = vmatpush.bf16.msrb.mxu2 %v412_v22 }
 0x19c   :  { %463 = vmatpush.bf16.msrb.mxu2 %v411_v24 }
 0x19f   :  { %586 = vmatmul.msk.bf16.vlgmr.msrb.gmra.mxu2 %vm449_vm2, %v601_v25 }
 0x1af   :  { %587 = vmatmul.msk.bf16.gmra.mxu2 %vm449_vm2, %v602_v26 }
 0x222   :  { %v465_v27 = vpop.f32.mrf.mxu2 }
 0x223   :  { %v466_v38 = vadd.f32 %v465_v27, %v422_v37 }
 0x225   :  { %v475_v43 = vmax.f32 %v466_v38, 0.0 }
 0x22a   :  { %v467_v28 = vpop.f32.mrf.mxu2 }
 0x22b   :  { %v468_v35 = vadd.f32 %v467_v28, %v427_v33 }
 0x22d   :  { %v476_v41 = vmax.f32 %v468_v35, 0.0 }
 0x22f   :  { %v480_v44 = vpack.c.bf16 %v476_v41, %v475_v43 }
 0x232   :  { %v470_v30 = vpop.f32.mrf.mxu2 }
 0x233   :  { %v471_v32 = vadd.f32 %v470_v30, %v432_v29 }
 0x235   :  { %v477_v39 = vmax.f32 %v471_v32, 0.0 }
 0x23a   :  { %v472_v34 = vpop.f32.mrf.mxu2 }
 0x23b   :  { %v473_v36 = vadd.f32 %v472_v34, %v437_v31 }
 0x23d   :  { %v478_v40 = vmax.f32 %v473_v36, 0.0 }
 0x23f   :  { %v481_v42 = vpack.c.bf16 %v478_v40, %v477_v39 }
 0x241   :  { %498 = vmatpush.bf16.msrb.mxu3 %v481_v42 }
 0x245   :  { %499 = vmatpush.bf16.msrb.mxu3 %v480_v44 }
 0x248   :  { %588 = vmatmul.msk.bf16.vlgmr.msrb.gmra.mxu3 %vm488_vm3, %v479_v46 }
 0x2cb   :  { %v501_v45 = vpop.f32.mrf.mxu3 }
 0x2cc   :  { %v502_v48 = vadd.f32 %v501_v45, %v486_v47 }
 0x2ce   :  { %505 = vst [vmem:[#allocation2] sm:$0xff] %v502_v48 }
 0x2cf   :  { %516 = dma.vmem_to_hbm [thread:$0]  %s512_s25, 128, %s514_s28, [#allocation3]  }
 0x2d3   :  { %v503_v49 = vpop.f32.mrf.mxu3 }
 0x2d4   :  { %641 = dma.done.wait [#allocation3], 128  }
 0x2d5   :  { %642 = vsyncadd [#allocation3], 4294967168 }
 0x2d6   :  { %521 = vsyncpa [#allocation3], 1 }

</bundles_post_ra>
